<compile_context>
chip_gen: v7x
topology: tpu7x:2x2x1
jax: 0.10.0
libtpu: 0.0.40
codegen_flags: <defaults>
</compile_context>

<pallas_src>
import jax
import jax.numpy as jnp
from jax.experimental import pallas as pl
from jax.experimental.pallas import tpu as pltpu

# ---------------- model dims (small, deterministic) ----------------
B = 8          # batch
T = 8          # sequence length
I = 16         # input_size
H = 32         # hidden_size
FC1 = 32       # fc_1 output width
O = 4          # output_size
O_PAD = 128    # lane-dense padded output width
G8 = 8 * H     # interleaved gate width for both layers = 256
NUM_LAYERS = 2
LN_EPS = 1e-5


def lstm_model_kernel(x_ref,      # ((T+1)*B, I)   time-major, last block zeros
                      w_ref,      # (I + 2H, 8H)   rows 0:I = input proj, I: = block recurrent
                      fc_ref,     # (32, 256)      lanes 0:32 fc1_w, 128:256 fc2_w (padded)
                      rows_ref,   # (5, 256)       [bias_pack; ln_g; ln_b; fc1_b; fc2_b] (padded)
                      out_ref,    # (B, O_PAD)
                      gx_ref):    # VMEM scratch ((T+1)*B, 8H)
    # ---- hoisted input projection for both layers (biases folded) ----
    w_in = w_ref[0:I, :]                                   # (I, 8H)
    w_rec = w_ref[I:I + 2 * H, :]                          # (2H, 8H) block recurrent RHS
    bias_pack = rows_ref[0:1, :]                           # (1, 8H)
    gx_ref[...] = jnp.dot(x_ref[...], w_in,
                          preferred_element_type=jnp.float32) + bias_pack

    # ---- hoisted per-lane activation constants (single-tanh gate trick) ----
    # gate column layout: [i0|i1|f0|f1|g0|g1|o0|o1]; g lanes are 4H:6H.
    lane = jax.lax.broadcasted_iota(jnp.int32, (B, G8), 1)
    is_g = jnp.logical_and(lane >= 4 * H, lane < 6 * H)
    sc = jnp.where(is_g, 1.0, 0.5).astype(jnp.float32)    # pre-scale == post-scale
    sb = jnp.where(is_g, 0.0, 0.5).astype(jnp.float32)    # post-offset
    # sigmoid(x) = 0.5*tanh(0.5*x) + 0.5 on i/f/o lanes; plain tanh on g lanes.

    def activate(gates):
        return jnp.tanh(gates * sc) * sc + sb

    def cell_update(act, cc_prev):
        i_p = act[:, 0 * H:2 * H]                          # [i0|i1] (B, 2H)
        f_p = act[:, 2 * H:4 * H]
        g_p = act[:, 4 * H:6 * H]
        o_p = act[:, 6 * H:8 * H]
        cc_new = f_p * cc_prev + i_p * g_p                 # packed c0|c1
        hc_new = o_p * jnp.tanh(cc_new)                    # one (8,64) EUP push
        return hc_new, cc_new

    # ---- step 0: layer 0 only (h_{-1} = c_{-1} = 0 => no recurrent matmul) ----
    zeros_state = jnp.zeros((B, 2 * H), jnp.float32)
    act0 = activate(gx_ref[0:B, :])
    hc, cc = cell_update(act0, zeros_state)
    layer0_mask = jnp.where(
        jax.lax.broadcasted_iota(jnp.int32, (B, 2 * H), 1) < H, 1.0, 0.0
    ).astype(jnp.float32)
    hc = hc * layer0_mask                                  # keep only layer-0 state
    cc = cc * layer0_mask

    # ---- steps 1..T: interleaved (layer 0 at t=s, layer 1 at t=s-1) ----
    # Single fused matmul per step covers layer-0 recurrence, layer-1 input
    # projection and layer-1 recurrence. Final step (s=T) reuses the body: the
    # zero-padded x block makes its layer-0 half spurious (discarded).
    for s in range(1, T + 1):                              # static unroll, T small
        mm = jnp.dot(hc, w_rec, preferred_element_type=jnp.float32)   # (B, 8H)
        gates = mm + gx_ref[s * B:(s + 1) * B, :]
        act = activate(gates)
        hc, cc = cell_update(act, cc)

    last = hc[:, H:2 * H]                                  # h1_{T-1} = output[:, -1, :]

    # ---- LayerNorm over hidden dim (biased variance, like PyTorch) ----
    ln_g = rows_ref[1:2, 0:H]
    ln_b = rows_ref[2:3, 0:H]
    mean = jnp.mean(last, axis=-1, keepdims=True)
    var = jnp.mean((last - mean) ** 2, axis=-1, keepdims=True)
    ln = (last - mean) * jax.lax.rsqrt(var + LN_EPS) * ln_g + ln_b

    # ---- head: sigmoid -> fc1 -> (dropout=identity) -> sigmoid -> fc2 ----
    fc1_w = fc_ref[:, 0:FC1]                               # (H, 32)
    fc1_b = rows_ref[3:4, 0:FC1]
    fc2_w = fc_ref[:, O_PAD:2 * O_PAD]                     # (32, 128) zero-padded
    fc2_b = rows_ref[4:5, 0:O_PAD]
    z = jax.nn.sigmoid(ln)
    z = jnp.dot(z, fc1_w, preferred_element_type=jnp.float32) + fc1_b
    # TODO(synk): nn.Dropout is identity at inference (eval mode); not applied.
    z = jax.nn.sigmoid(z)
    out = jnp.dot(z, fc2_w, preferred_element_type=jnp.float32) + fc2_b
    out_ref[...] = out.astype(out_ref.dtype)               # (8,128) unmasked store


def _interleave_gate_cols(a, b):
    """(R,4H) x (R,4H), gate blocks [i|f|g|o] -> (R,8H) [a_i|b_i|a_f|b_f|...]."""
    parts = []
    for g in range(4):
        parts.append(a[:, g * H:(g + 1) * H])
        parts.append(b[:, g * H:(g + 1) * H])
    return jnp.concatenate(parts, axis=1)


def _pad_lanes(r, width):
    return jnp.pad(r, ((0, 0), (0, width - r.shape[1])))


def lstm_model_forward(x, params):
    # Time-major flatten; pad one extra zero row-block so the final
    # (layer-1-only) interleaved step reuses the uniform loop body.
    x_tb = jnp.transpose(x, (1, 0, 2)).reshape(T * B, I)
    x_pad = jnp.concatenate([x_tb, jnp.zeros((B, I), jnp.float32)], axis=0)

    # Main weight slab: hoisted input projection (interleaved cols, layer-1
    # half zero) stacked on the fused block recurrent RHS.
    w_in = _interleave_gate_cols(params["wih0"], jnp.zeros((I, 4 * H), jnp.float32))
    w_rec_top = _interleave_gate_cols(params["whh0"], params["wih1"])
    w_rec_bot = _interleave_gate_cols(jnp.zeros((H, 4 * H), jnp.float32), params["whh1"])
    w_main = jnp.concatenate([w_in, w_rec_top, w_rec_bot], axis=0)   # (I+2H, 8H)

    # fc weight slab: fc1_w at lanes 0:32, zero-padded fc2_w at lanes 128:256.
    fc1_w_p = _pad_lanes(params["fc1_w"], O_PAD)                      # (32, 128)
    fc2_w_p = _pad_lanes(params["fc2_w"], O_PAD)                      # (32, 128)
    fc_slab = jnp.concatenate([fc1_w_p, fc2_w_p], axis=1)             # (32, 256)

    # Row-parameter slab (single prologue DMA for all small (1,N) params).
    bias_pack = _interleave_gate_cols(params["b0"], params["b1"])     # (1, 8H)
    rows = jnp.concatenate([
        bias_pack,
        _pad_lanes(params["ln_g"], G8),
        _pad_lanes(params["ln_b"], G8),
        _pad_lanes(params["fc1_b"], G8),
        _pad_lanes(_pad_lanes(params["fc2_b"], O_PAD), G8),
    ], axis=0)                                                        # (5, 256)

    args = (x_pad, w_main, fc_slab, rows)
    vmem_spec = pl.BlockSpec(memory_space=pltpu.MemorySpace.VMEM)
    out_padded = pl.pallas_call(
        lstm_model_kernel,
        out_shape=jax.ShapeDtypeStruct((B, O_PAD), jnp.float32),
        in_specs=[vmem_spec] * len(args),
        out_specs=vmem_spec,
        scratch_shapes=[pltpu.VMEM(((T + 1) * B, G8), jnp.float32)],
    )(*args)
    return out_padded[:, :O]


# ---------------- pure-JAX reference (same math, no Pallas) ----------------
def reference_forward(x, params):
    def run_layer(xs, wih, whh, b):
        h = jnp.zeros((B, H), jnp.float32)
        c = jnp.zeros((B, H), jnp.float32)
        outs = []
        for t in range(T):
            gates = xs[t] @ wih + h @ whh + b
            i_g = jax.nn.sigmoid(gates[:, 0 * H:1 * H])
            f_g = jax.nn.sigmoid(gates[:, 1 * H:2 * H])
            g_g = jnp.tanh(gates[:, 2 * H:3 * H])
            o_g = jax.nn.sigmoid(gates[:, 3 * H:4 * H])
            c = f_g * c + i_g * g_g
            h = o_g * jnp.tanh(c)
            outs.append(h)
        return outs

    xs0 = [x[:, t, :] for t in range(T)]
    outs0 = run_layer(xs0, params["wih0"], params["whh0"], params["b0"])
    outs1 = run_layer(outs0, params["wih1"], params["whh1"], params["b1"])
    last = outs1[-1]
    mean = jnp.mean(last, axis=-1, keepdims=True)
    var = jnp.mean((last - mean) ** 2, axis=-1, keepdims=True)
    ln = (last - mean) / jnp.sqrt(var + LN_EPS) * params["ln_g"] + params["ln_b"]
    out = jax.nn.sigmoid(ln)
    out = jax.nn.sigmoid(out @ params["fc1_w"] + params["fc1_b"])
    return out @ params["fc2_w"] + params["fc2_b"]


def init_params(key):
    """Deterministic init, PyTorch-style uniform(-1/sqrt(H), 1/sqrt(H)).

    LSTM weights stored pre-transposed: W_ih^T -> (in, 4H), W_hh^T -> (H, 4H).
    Biases b_ih + b_hh pre-summed -> (1, 4H). Linear weights stored as (in, out).
    """
    ks = jax.random.split(key, 16)
    stdv = 1.0 / jnp.sqrt(jnp.float32(H))

    def u(k, shape, s):
        return jax.random.uniform(k, shape, jnp.float32, -s, s)

    params = {
        # layer 0: input_size -> hidden_size
        "wih0": u(ks[0], (I, 4 * H), stdv),
        "whh0": u(ks[1], (H, 4 * H), stdv),
        "b0":   u(ks[2], (1, 4 * H), stdv) + u(ks[3], (1, 4 * H), stdv),
        # layer 1: hidden_size -> hidden_size
        "wih1": u(ks[4], (H, 4 * H), stdv),
        "whh1": u(ks[5], (H, 4 * H), stdv),
        "b1":   u(ks[6], (1, 4 * H), stdv) + u(ks[7], (1, 4 * H), stdv),
        # layer norm
        "ln_g": jnp.ones((1, H), jnp.float32),
        "ln_b": jnp.zeros((1, H), jnp.float32),
        # fc_1: H -> 32
        "fc1_w": u(ks[8], (H, FC1), 1.0 / jnp.sqrt(jnp.float32(H))),
        "fc1_b": u(ks[9], (1, FC1), 1.0 / jnp.sqrt(jnp.float32(H))),
        # fc_2: 32 -> O
        "fc2_w": u(ks[10], (FC1, O), 1.0 / jnp.sqrt(jnp.float32(FC1))),
        "fc2_b": u(ks[11], (1, O), 1.0 / jnp.sqrt(jnp.float32(FC1))),
    }
    return params


if __name__ == "__main__":
    key = jax.random.PRNGKey(0)
    k_x, k_p = jax.random.split(key)
    x = jax.random.normal(k_x, (B, T, I), jnp.float32)
    params = init_params(k_p)

    out = lstm_model_forward(x, params)
    out = jax.block_until_ready(out)

    ref = reference_forward(x, params)
    assert out.shape == (B, O), out.shape
    assert jnp.allclose(out, ref, atol=1e-4, rtol=1e-4), (
        f"max abs err {jnp.max(jnp.abs(out - ref))}")

    print("KERNEL_OK")
</pallas_src>

<mosaic_0001>
module attributes {stable_mosaic.version = 11 : i64} {
  func.func @lstm_model_kernel(%arg0: memref<72x16xf32, #tpu.memory_space<vmem>>, %arg1: memref<80x256xf32, #tpu.memory_space<vmem>>, %arg2: memref<32x256xf32, #tpu.memory_space<vmem>>, %arg3: memref<5x256xf32, #tpu.memory_space<vmem>>, %arg4: memref<8x128xf32, #tpu.memory_space<vmem>>, %arg5: memref<72x256xf32, #tpu.memory_space<vmem>>) attributes {dimension_semantics = [], scalar_prefetch = 0 : i64, scratch_operands = 1 : i64, tpu.core_type = #tpu.core_type<tc>} {
    %c0 = arith.constant 0 : index
    %c0_0 = arith.constant 0 : index
    %0 = vector.load %arg1[%c0, %c0_0] : memref<80x256xf32, #tpu.memory_space<vmem>>, vector<16x256xf32>
    %c16 = arith.constant 16 : index
    %c0_1 = arith.constant 0 : index
    %1 = vector.load %arg1[%c16, %c0_1] : memref<80x256xf32, #tpu.memory_space<vmem>>, vector<64x256xf32>
    %c0_2 = arith.constant 0 : index
    %c0_3 = arith.constant 0 : index
    %2 = vector.load %arg3[%c0_2, %c0_3] : memref<5x256xf32, #tpu.memory_space<vmem>>, vector<1x256xf32>
    %c0_4 = arith.constant 0 : index
    %c0_5 = arith.constant 0 : index
    %3 = vector.load %arg0[%c0_4, %c0_5] : memref<72x16xf32, #tpu.memory_space<vmem>>, vector<72x16xf32>
    %cst = arith.constant dense<0.000000e+00> : vector<72x256xf32>
    %4 = tpu.matmul %3, %0, %cst {dimension_numbers = #tpu.dot_dimension_numbers<[1], [0], [0], [1], [0, 0, 1, 1], [], []>} : vector<72x16xf32>, vector<16x256xf32>, vector<72x256xf32> -> vector<72x256xf32>
    %5 = vector.broadcast %2 : vector<1x256xf32> to vector<72x256xf32>
    %6 = arith.addf %4, %5 : vector<72x256xf32>
    %c0_6 = arith.constant 0 : index
    %c0_7 = arith.constant 0 : index
    %7 = vector.load %arg5[%c0_6, %c0_7] : memref<72x256xf32, #tpu.memory_space<vmem>>, vector<72x256xf32>
    tpu.vector_store %arg5[%c0_6, %c0_7], %6 {strides = array<i32>} : memref<72x256xf32, #tpu.memory_space<vmem>>, vector<72x256xf32>,
    %8 = tpu.iota {dimensions = array<i32: 1>} : vector<8x256xi32>
    %c128_i32 = arith.constant 128 : i32
    %9 = vector.broadcast %c128_i32 : i32 to vector<8x256xi32>
    %10 = arith.cmpi sge, %8, %9 : vector<8x256xi32>
    %c192_i32 = arith.constant 192 : i32
    %11 = vector.broadcast %c192_i32 : i32 to vector<8x256xi32>
    %12 = arith.cmpi slt, %8, %11 : vector<8x256xi32>
    %13 = arith.andi %10, %12 : vector<8x256xi1>
    %cst_8 = arith.constant 1.000000e+00 : f32
    %cst_9 = arith.constant 5.000000e-01 : f32
    %14 = vector.broadcast %cst_8 : f32 to vector<8x256xf32>
    %15 = vector.broadcast %cst_9 : f32 to vector<8x256xf32>
    %16 = arith.select %13, %14, %15 : vector<8x256xi1>, vector<8x256xf32>
    %cst_10 = arith.constant 0.000000e+00 : f32
    %cst_11 = arith.constant 5.000000e-01 : f32
    %17 = vector.broadcast %cst_10 : f32 to vector<8x256xf32>
    %18 = vector.broadcast %cst_11 : f32 to vector<8x256xf32>
    %19 = arith.select %13, %17, %18 : vector<8x256xi1>, vector<8x256xf32>
    %cst_12 = arith.constant 0.000000e+00 : f32
    %20 = vector.broadcast %cst_12 : f32 to vector<8x64xf32>
    %c0_13 = arith.constant 0 : index
    %c0_14 = arith.constant 0 : index
    %21 = vector.load %arg5[%c0_13, %c0_14] : memref<72x256xf32, #tpu.memory_space<vmem>>, vector<8x256xf32>
    %22 = arith.mulf %21, %16 : vector<8x256xf32>
    %23 = math.tanh %22 : vector<8x256xf32>
    %24 = arith.mulf %23, %16 : vector<8x256xf32>
    %25 = arith.addf %24, %19 : vector<8x256xf32>
    %26 = vector.extract_strided_slice %25 {offsets = [0, 0], sizes = [8, 64], strides = [1, 1]} : vector<8x256xf32> to vector<8x64xf32>
    %27 = vector.extract_strided_slice %25 {offsets = [0, 64], sizes = [8, 64], strides = [1, 1]} : vector<8x256xf32> to vector<8x64xf32>
    %28 = vector.extract_strided_slice %25 {offsets = [0, 128], sizes = [8, 64], strides = [1, 1]} : vector<8x256xf32> to vector<8x64xf32>
    %29 = vector.extract_strided_slice %25 {offsets = [0, 192], sizes = [8, 64], strides = [1, 1]} : vector<8x256xf32> to vector<8x64xf32>
    %30 = arith.mulf %27, %20 : vector<8x64xf32>
    %31 = arith.mulf %26, %28 : vector<8x64xf32>
    %32 = arith.addf %30, %31 : vector<8x64xf32>
    %33 = math.tanh %32 : vector<8x64xf32>
    %34 = arith.mulf %29, %33 : vector<8x64xf32>
    %35 = tpu.iota {dimensions = array<i32: 1>} : vector<8x64xi32>
    %c32_i32 = arith.constant 32 : i32
    %36 = vector.broadcast %c32_i32 : i32 to vector<8x64xi32>
    %37 = arith.cmpi slt, %35, %36 : vector<8x64xi32>
    %cst_15 = arith.constant 1.000000e+00 : f32
    %cst_16 = arith.constant 0.000000e+00 : f32
    %38 = vector.broadcast %cst_15 : f32 to vector<8x64xf32>
    %39 = vector.broadcast %cst_16 : f32 to vector<8x64xf32>
    %40 = arith.select %37, %38, %39 : vector<8x64xi1>, vector<8x64xf32>
    %41 = arith.mulf %34, %40 : vector<8x64xf32>
    %42 = arith.mulf %32, %40 : vector<8x64xf32>
    %cst_17 = arith.constant dense<0.000000e+00> : vector<8x256xf32>
    %43 = tpu.matmul %41, %1, %cst_17 {dimension_numbers = #tpu.dot_dimension_numbers<[1], [0], [0], [1], [0, 0, 1, 1], [], []>} : vector<8x64xf32>, vector<64x256xf32>, vector<8x256xf32> -> vector<8x256xf32>
    %c8 = arith.constant 8 : index
    %c0_18 = arith.constant 0 : index
    %44 = vector.load %arg5[%c8, %c0_18] : memref<72x256xf32, #tpu.memory_space<vmem>>, vector<8x256xf32>
    %45 = arith.addf %43, %44 : vector<8x256xf32>
    %46 = arith.mulf %45, %16 : vector<8x256xf32>
    %47 = math.tanh %46 : vector<8x256xf32>
    %48 = arith.mulf %47, %16 : vector<8x256xf32>
    %49 = arith.addf %48, %19 : vector<8x256xf32>
    %50 = vector.extract_strided_slice %49 {offsets = [0, 0], sizes = [8, 64], strides = [1, 1]} : vector<8x256xf32> to vector<8x64xf32>
    %51 = vector.extract_strided_slice %49 {offsets = [0, 64], sizes = [8, 64], strides = [1, 1]} : vector<8x256xf32> to vector<8x64xf32>
    %52 = vector.extract_strided_slice %49 {offsets = [0, 128], sizes = [8, 64], strides = [1, 1]} : vector<8x256xf32> to vector<8x64xf32>
    %53 = vector.extract_strided_slice %49 {offsets = [0, 192], sizes = [8, 64], strides = [1, 1]} : vector<8x256xf32> to vector<8x64xf32>
    %54 = arith.mulf %51, %42 : vector<8x64xf32>
    %55 = arith.mulf %50, %52 : vector<8x64xf32>
    %56 = arith.addf %54, %55 : vector<8x64xf32>
    %57 = math.tanh %56 : vector<8x64xf32>
    %58 = arith.mulf %53, %57 : vector<8x64xf32>
    %cst_19 = arith.constant dense<0.000000e+00> : vector<8x256xf32>
    %59 = tpu.matmul %58, %1, %cst_19 {dimension_numbers = #tpu.dot_dimension_numbers<[1], [0], [0], [1], [0, 0, 1, 1], [], []>} : vector<8x64xf32>, vector<64x256xf32>, vector<8x256xf32> -> vector<8x256xf32>
    %c16_20 = arith.constant 16 : index
    %c0_21 = arith.constant 0 : index
    %60 = vector.load %arg5[%c16_20, %c0_21] : memref<72x256xf32, #tpu.memory_space<vmem>>, vector<8x256xf32>
    %61 = arith.addf %59, %60 : vector<8x256xf32>
    %62 = arith.mulf %61, %16 : vector<8x256xf32>
    %63 = math.tanh %62 : vector<8x256xf32>
    %64 = arith.mulf %63, %16 : vector<8x256xf32>
    %65 = arith.addf %64, %19 : vector<8x256xf32>
    %66 = vector.extract_strided_slice %65 {offsets = [0, 0], sizes = [8, 64], strides = [1, 1]} : vector<8x256xf32> to vector<8x64xf32>
    %67 = vector.extract_strided_slice %65 {offsets = [0, 64], sizes = [8, 64], strides = [1, 1]} : vector<8x256xf32> to vector<8x64xf32>
    %68 = vector.extract_strided_slice %65 {offsets = [0, 128], sizes = [8, 64], strides = [1, 1]} : vector<8x256xf32> to vector<8x64xf32>
    %69 = vector.extract_strided_slice %65 {offsets = [0, 192], sizes = [8, 64], strides = [1, 1]} : vector<8x256xf32> to vector<8x64xf32>
    %70 = arith.mulf %67, %56 : vector<8x64xf32>
    %71 = arith.mulf %66, %68 : vector<8x64xf32>
    %72 = arith.addf %70, %71 : vector<8x64xf32>
    %73 = math.tanh %72 : vector<8x64xf32>
    %74 = arith.mulf %69, %73 : vector<8x64xf32>
    %cst_22 = arith.constant dense<0.000000e+00> : vector<8x256xf32>
    %75 = tpu.matmul %74, %1, %cst_22 {dimension_numbers = #tpu.dot_dimension_numbers<[1], [0], [0], [1], [0, 0, 1, 1], [], []>} : vector<8x64xf32>, vector<64x256xf32>, vector<8x256xf32> -> vector<8x256xf32>
    %c24 = arith.constant 24 : index
    %c0_23 = arith.constant 0 : index
    %76 = vector.load %arg5[%c24, %c0_23] : memref<72x256xf32, #tpu.memory_space<vmem>>, vector<8x256xf32>
    %77 = arith.addf %75, %76 : vector<8x256xf32>
    %78 = arith.mulf %77, %16 : vector<8x256xf32>
    %79 = math.tanh %78 : vector<8x256xf32>
    %80 = arith.mulf %79, %16 : vector<8x256xf32>
    %81 = arith.addf %80, %19 : vector<8x256xf32>
    %82 = vector.extract_strided_slice %81 {offsets = [0, 0], sizes = [8, 64], strides = [1, 1]} : vector<8x256xf32> to vector<8x64xf32>
    %83 = vector.extract_strided_slice %81 {offsets = [0, 64], sizes = [8, 64], strides = [1, 1]} : vector<8x256xf32> to vector<8x64xf32>
    %84 = vector.extract_strided_slice %81 {offsets = [0, 128], sizes = [8, 64], strides = [1, 1]} : vector<8x256xf32> to vector<8x64xf32>
    %85 = vector.extract_strided_slice %81 {offsets = [0, 192], sizes = [8, 64], strides = [1, 1]} : vector<8x256xf32> to vector<8x64xf32>
    %86 = arith.mulf %83, %72 : vector<8x64xf32>
    %87 = arith.mulf %82, %84 : vector<8x64xf32>
    %88 = arith.addf %86, %87 : vector<8x64xf32>
    %89 = math.tanh %88 : vector<8x64xf32>
    %90 = arith.mulf %85, %89 : vector<8x64xf32>
    %cst_24 = arith.constant dense<0.000000e+00> : vector<8x256xf32>
    %91 = tpu.matmul %90, %1, %cst_24 {dimension_numbers = #tpu.dot_dimension_numbers<[1], [0], [0], [1], [0, 0, 1, 1], [], []>} : vector<8x64xf32>, vector<64x256xf32>, vector<8x256xf32> -> vector<8x256xf32>
    %c32 = arith.constant 32 : index
    %c0_25 = arith.constant 0 : index
    %92 = vector.load %arg5[%c32, %c0_25] : memref<72x256xf32, #tpu.memory_space<vmem>>, vector<8x256xf32>
    %93 = arith.addf %91, %92 : vector<8x256xf32>
    %94 = arith.mulf %93, %16 : vector<8x256xf32>
    %95 = math.tanh %94 : vector<8x256xf32>
    %96 = arith.mulf %95, %16 : vector<8x256xf32>
    %97 = arith.addf %96, %19 : vector<8x256xf32>
    %98 = vector.extract_strided_slice %97 {offsets = [0, 0], sizes = [8, 64], strides = [1, 1]} : vector<8x256xf32> to vector<8x64xf32>
    %99 = vector.extract_strided_slice %97 {offsets = [0, 64], sizes = [8, 64], strides = [1, 1]} : vector<8x256xf32> to vector<8x64xf32>
    %100 = vector.extract_strided_slice %97 {offsets = [0, 128], sizes = [8, 64], strides = [1, 1]} : vector<8x256xf32> to vector<8x64xf32>
    %101 = vector.extract_strided_slice %97 {offsets = [0, 192], sizes = [8, 64], strides = [1, 1]} : vector<8x256xf32> to vector<8x64xf32>
    %102 = arith.mulf %99, %88 : vector<8x64xf32>
    %103 = arith.mulf %98, %100 : vector<8x64xf32>
    %104 = arith.addf %102, %103 : vector<8x64xf32>
    %105 = math.tanh %104 : vector<8x64xf32>
    %106 = arith.mulf %101, %105 : vector<8x64xf32>
    %cst_26 = arith.constant dense<0.000000e+00> : vector<8x256xf32>
    %107 = tpu.matmul %106, %1, %cst_26 {dimension_numbers = #tpu.dot_dimension_numbers<[1], [0], [0], [1], [0, 0, 1, 1], [], []>} : vector<8x64xf32>, vector<64x256xf32>, vector<8x256xf32> -> vector<8x256xf32>
    %c40 = arith.constant 40 : index
    %c0_27 = arith.constant 0 : index
    %108 = vector.load %arg5[%c40, %c0_27] : memref<72x256xf32, #tpu.memory_space<vmem>>, vector<8x256xf32>
    %109 = arith.addf %107, %108 : vector<8x256xf32>
    %110 = arith.mulf %109, %16 : vector<8x256xf32>
    %111 = math.tanh %110 : vector<8x256xf32>
    %112 = arith.mulf %111, %16 : vector<8x256xf32>
    %113 = arith.addf %112, %19 : vector<8x256xf32>
    %114 = vector.extract_strided_slice %113 {offsets = [0, 0], sizes = [8, 64], strides = [1, 1]} : vector<8x256xf32> to vector<8x64xf32>
    %115 = vector.extract_strided_slice %113 {offsets = [0, 64], sizes = [8, 64], strides = [1, 1]} : vector<8x256xf32> to vector<8x64xf32>
    %116 = vector.extract_strided_slice %113 {offsets = [0, 128], sizes = [8, 64], strides = [1, 1]} : vector<8x256xf32> to vector<8x64xf32>
    %117 = vector.extract_strided_slice %113 {offsets = [0, 192], sizes = [8, 64], strides = [1, 1]} : vector<8x256xf32> to vector<8x64xf32>
    %118 = arith.mulf %115, %104 : vector<8x64xf32>
    %119 = arith.mulf %114, %116 : vector<8x64xf32>
    %120 = arith.addf %118, %119 : vector<8x64xf32>
    %121 = math.tanh %120 : vector<8x64xf32>
    %122 = arith.mulf %117, %121 : vector<8x64xf32>
    %cst_28 = arith.constant dense<0.000000e+00> : vector<8x256xf32>
    %123 = tpu.matmul %122, %1, %cst_28 {dimension_numbers = #tpu.dot_dimension_numbers<[1], [0], [0], [1], [0, 0, 1, 1], [], []>} : vector<8x64xf32>, vector<64x256xf32>, vector<8x256xf32> -> vector<8x256xf32>
    %c48 = arith.constant 48 : index
    %c0_29 = arith.constant 0 : index
    %124 = vector.load %arg5[%c48, %c0_29] : memref<72x256xf32, #tpu.memory_space<vmem>>, vector<8x256xf32>
    %125 = arith.addf %123, %124 : vector<8x256xf32>
    %126 = arith.mulf %125, %16 : vector<8x256xf32>
    %127 = math.tanh %126 : vector<8x256xf32>
    %128 = arith.mulf %127, %16 : vector<8x256xf32>
    %129 = arith.addf %128, %19 : vector<8x256xf32>
    %130 = vector.extract_strided_slice %129 {offsets = [0, 0], sizes = [8, 64], strides = [1, 1]} : vector<8x256xf32> to vector<8x64xf32>
    %131 = vector.extract_strided_slice %129 {offsets = [0, 64], sizes = [8, 64], strides = [1, 1]} : vector<8x256xf32> to vector<8x64xf32>
    %132 = vector.extract_strided_slice %129 {offsets = [0, 128], sizes = [8, 64], strides = [1, 1]} : vector<8x256xf32> to vector<8x64xf32>
    %133 = vector.extract_strided_slice %129 {offsets = [0, 192], sizes = [8, 64], strides = [1, 1]} : vector<8x256xf32> to vector<8x64xf32>
    %134 = arith.mulf %131, %120 : vector<8x64xf32>
    %135 = arith.mulf %130, %132 : vector<8x64xf32>
    %136 = arith.addf %134, %135 : vector<8x64xf32>
    %137 = math.tanh %136 : vector<8x64xf32>
    %138 = arith.mulf %133, %137 : vector<8x64xf32>
    %cst_30 = arith.constant dense<0.000000e+00> : vector<8x256xf32>
    %139 = tpu.matmul %138, %1, %cst_30 {dimension_numbers = #tpu.dot_dimension_numbers<[1], [0], [0], [1], [0, 0, 1, 1], [], []>} : vector<8x64xf32>, vector<64x256xf32>, vector<8x256xf32> -> vector<8x256xf32>
    %c56 = arith.constant 56 : index
    %c0_31 = arith.constant 0 : index
    %140 = vector.load %arg5[%c56, %c0_31] : memref<72x256xf32, #tpu.memory_space<vmem>>, vector<8x256xf32>
    %141 = arith.addf %139, %140 : vector<8x256xf32>
    %142 = arith.mulf %141, %16 : vector<8x256xf32>
    %143 = math.tanh %142 : vector<8x256xf32>
    %144 = arith.mulf %143, %16 : vector<8x256xf32>
    %145 = arith.addf %144, %19 : vector<8x256xf32>
    %146 = vector.extract_strided_slice %145 {offsets = [0, 0], sizes = [8, 64], strides = [1, 1]} : vector<8x256xf32> to vector<8x64xf32>
    %147 = vector.extract_strided_slice %145 {offsets = [0, 64], sizes = [8, 64], strides = [1, 1]} : vector<8x256xf32> to vector<8x64xf32>
    %148 = vector.extract_strided_slice %145 {offsets = [0, 128], sizes = [8, 64], strides = [1, 1]} : vector<8x256xf32> to vector<8x64xf32>
    %149 = vector.extract_strided_slice %145 {offsets = [0, 192], sizes = [8, 64], strides = [1, 1]} : vector<8x256xf32> to vector<8x64xf32>
    %150 = arith.mulf %147, %136 : vector<8x64xf32>
    %151 = arith.mulf %146, %148 : vector<8x64xf32>
    %152 = arith.addf %150, %151 : vector<8x64xf32>
    %153 = math.tanh %152 : vector<8x64xf32>
    %154 = arith.mulf %149, %153 : vector<8x64xf32>
    %cst_32 = arith.constant dense<0.000000e+00> : vector<8x256xf32>
    %155 = tpu.matmul %154, %1, %cst_32 {dimension_numbers = #tpu.dot_dimension_numbers<[1], [0], [0], [1], [0, 0, 1, 1], [], []>} : vector<8x64xf32>, vector<64x256xf32>, vector<8x256xf32> -> vector<8x256xf32>
    %c64 = arith.constant 64 : index
    %c0_33 = arith.constant 0 : index
    %156 = vector.load %arg5[%c64, %c0_33] : memref<72x256xf32, #tpu.memory_space<vmem>>, vector<8x256xf32>
    %157 = arith.addf %155, %156 : vector<8x256xf32>
    %158 = arith.mulf %157, %16 : vector<8x256xf32>
    %159 = math.tanh %158 : vector<8x256xf32>
    %160 = arith.mulf %159, %16 : vector<8x256xf32>
    %161 = arith.addf %160, %19 : vector<8x256xf32>
    %162 = vector.extract_strided_slice %161 {offsets = [0, 0], sizes = [8, 64], strides = [1, 1]} : vector<8x256xf32> to vector<8x64xf32>
    %163 = vector.extract_strided_slice %161 {offsets = [0, 64], sizes = [8, 64], strides = [1, 1]} : vector<8x256xf32> to vector<8x64xf32>
    %164 = vector.extract_strided_slice %161 {offsets = [0, 128], sizes = [8, 64], strides = [1, 1]} : vector<8x256xf32> to vector<8x64xf32>
    %165 = vector.extract_strided_slice %161 {offsets = [0, 192], sizes = [8, 64], strides = [1, 1]} : vector<8x256xf32> to vector<8x64xf32>
    %166 = arith.mulf %163, %152 : vector<8x64xf32>
    %167 = arith.mulf %162, %164 : vector<8x64xf32>
    %168 = arith.addf %166, %167 : vector<8x64xf32>
    %169 = math.tanh %168 : vector<8x64xf32>
    %170 = arith.mulf %165, %169 : vector<8x64xf32>
    %171 = vector.extract_strided_slice %170 {offsets = [0, 32], sizes = [8, 32], strides = [1, 1]} : vector<8x64xf32> to vector<8x32xf32>
    %c1 = arith.constant 1 : index
    %c0_34 = arith.constant 0 : index
    %172 = vector.load %arg3[%c1, %c0_34] : memref<5x256xf32, #tpu.memory_space<vmem>>, vector<1x32xf32>
    %c2 = arith.constant 2 : index
    %c0_35 = arith.constant 0 : index
    %173 = vector.load %arg3[%c2, %c0_35] : memref<5x256xf32, #tpu.memory_space<vmem>>, vector<1x32xf32>
    %cst_36 = arith.constant dense<0.000000e+00> : vector<8xf32>
    %174 = vector.multi_reduction <add>, %171, %cst_36 [1] : vector<8x32xf32> to vector<8xf32>
    %175 = vector.shape_cast %174 : vector<8xf32> to vector<8x1xf32>
    %cst_37 = arith.constant 3.200000e+01 : f32
    %176 = vector.broadcast %cst_37 : f32 to vector<8x1xf32>
    %177 = arith.divf %175, %176 : vector<8x1xf32>
    %178 = vector.broadcast %177 : vector<8x1xf32> to vector<8x32xf32>
    %179 = arith.subf %171, %178 : vector<8x32xf32>
    %180 = arith.mulf %179, %179 : vector<8x32xf32>
    %cst_38 = arith.constant dense<0.000000e+00> : vector<8xf32>
    %181 = vector.multi_reduction <add>, %180, %cst_38 [1] : vector<8x32xf32> to vector<8xf32>
    %182 = vector.shape_cast %181 : vector<8xf32> to vector<8x1xf32>
    %cst_39 = arith.constant 3.200000e+01 : f32
    %183 = vector.broadcast %cst_39 : f32 to vector<8x1xf32>
    %184 = arith.divf %182, %183 : vector<8x1xf32>
    %185 = vector.broadcast %177 : vector<8x1xf32> to vector<8x32xf32>
    %186 = arith.subf %171, %185 : vector<8x32xf32>
    %cst_40 = arith.constant 9.99999974E-6 : f32
    %187 = vector.broadcast %cst_40 : f32 to vector<8x1xf32>
    %188 = arith.addf %184, %187 : vector<8x1xf32>
    %189 = math.rsqrt %188 : vector<8x1xf32>
    %190 = vector.broadcast %189 : vector<8x1xf32> to vector<8x32xf32>
    %191 = arith.mulf %186, %190 : vector<8x32xf32>
    %192 = vector.broadcast %172 : vector<1x32xf32> to vector<8x32xf32>
    %193 = arith.mulf %191, %192 : vector<8x32xf32>
    %194 = vector.broadcast %173 : vector<1x32xf32> to vector<8x32xf32>
    %195 = arith.addf %193, %194 : vector<8x32xf32>
    %c0_41 = arith.constant 0 : index
    %c0_42 = arith.constant 0 : index
    %196 = vector.load %arg2[%c0_41, %c0_42] : memref<32x256xf32, #tpu.memory_space<vmem>>, vector<32x32xf32>
    %c3 = arith.constant 3 : index
    %c0_43 = arith.constant 0 : index
    %197 = vector.load %arg3[%c3, %c0_43] : memref<5x256xf32, #tpu.memory_space<vmem>>, vector<1x32xf32>
    %c0_44 = arith.constant 0 : index
    %c128 = arith.constant 128 : index
    %198 = vector.load %arg2[%c0_44, %c128] : memref<32x256xf32, #tpu.memory_space<vmem>>, vector<32x128xf32>
    %c4 = arith.constant 4 : index
    %c0_45 = arith.constant 0 : index
    %199 = vector.load %arg3[%c4, %c0_45] : memref<5x256xf32, #tpu.memory_space<vmem>>, vector<1x128xf32>
    %200 = arith.negf %195 : vector<8x32xf32>
    %201 = math.exp %200 : vector<8x32xf32>
    %cst_46 = arith.constant 1.000000e+00 : f32
    %202 = vector.broadcast %cst_46 : f32 to vector<8x32xf32>
    %203 = arith.addf %202, %201 : vector<8x32xf32>
    %204 = arith.divf %202, %203 : vector<8x32xf32>
    %cst_47 = arith.constant dense<0.000000e+00> : vector<8x32xf32>
    %205 = tpu.matmul %204, %196, %cst_47 {dimension_numbers = #tpu.dot_dimension_numbers<[1], [0], [0], [1], [0, 0, 1, 1], [], []>} : vector<8x32xf32>, vector<32x32xf32>, vector<8x32xf32> -> vector<8x32xf32>
    %206 = vector.broadcast %197 : vector<1x32xf32> to vector<8x32xf32>
    %207 = arith.addf %205, %206 : vector<8x32xf32>
    %208 = arith.negf %207 : vector<8x32xf32>
    %209 = math.exp %208 : vector<8x32xf32>
    %cst_48 = arith.constant 1.000000e+00 : f32
    %210 = vector.broadcast %cst_48 : f32 to vector<8x32xf32>
    %211 = arith.addf %210, %209 : vector<8x32xf32>
    %212 = arith.divf %210, %211 : vector<8x32xf32>
    %cst_49 = arith.constant dense<0.000000e+00> : vector<8x128xf32>
    %213 = tpu.matmul %212, %198, %cst_49 {dimension_numbers = #tpu.dot_dimension_numbers<[1], [0], [0], [1], [0, 0, 1, 1], [], []>} : vector<8x32xf32>, vector<32x128xf32>, vector<8x128xf32> -> vector<8x128xf32>
    %214 = vector.broadcast %199 : vector<1x128xf32> to vector<8x128xf32>
    %215 = arith.addf %213, %214 : vector<8x128xf32>
    %c0_50 = arith.constant 0 : index
    %c0_51 = arith.constant 0 : index
    %216 = vector.load %arg4[%c0_50, %c0_51] : memref<8x128xf32, #tpu.memory_space<vmem>>, vector<8x128xf32>
    tpu.vector_store %arg4[%c0_50, %c0_51], %215 {strides = array<i32>} : memref<8x128xf32, #tpu.memory_space<vmem>>, vector<8x128xf32>,
    return
  }
}

</mosaic_0001>

<bundles_post_ra>
// kernel: tpu_custom_call.1
= control target key start
LH: loop header
LB: loop body
LE: loop exit
PB: predicated region body
PF: predicated region fallthrough
CT: control target
= control target key end

     0   :  { %9 = vsyncpa [#allocation4], 0  ;;  %s1973_s0 = inlined_call_operand.vmem [shape: f32[72,16], index: 0, kind: input, shape index: {}]   ;;  %s1974_s1 = inlined_call_operand.hbm [shape: f32[80,256], index: 1, kind: input, shape index: {}]   ;;  %s1975_s2 = inlined_call_operand.vmem [shape: f32[32,256], index: 2, kind: input, shape index: {}]   ;;  %s1976_s3 = inlined_call_operand.vmem [shape: f32[5,256], index: 3, kind: input, shape index: {}]   ;;  %s1977_s4 = inlined_call_operand.hbm [shape: f32[8,128], index: 4, kind: output, shape index: {}]  }
   0x1   :  { %10 = vsyncpa [#allocation5], 0  ;;  %s1612_s15 = smov [#allocation3]   ;;  %s1564_s19 = scalar_lea.hbm %s1974_s1, 2560 }
   0x2   :  { %s18_s16 = sshll.u32 %s1612_s15, 4  ;;  %p1565_p0 = scmp.ne.s32.totalorder %s1974_s1, %s1564_s19  ;;  %s19_s16 = int_to_ptr.vmem [resolvable:$true] %s18_s16 }
   0x3   :  { %p1568_p1 = scmp.lt.u32.totalorder %s1564_s19, %s1974_s1 }
   0x5   :  { %p1570_p2 = pnand %p1568_p1, %p1565_p0 }
   0x7   :  { %1573 = shalt.err (!%p1570_p2)
}
   0x8   :  { %s1574_s24 = scalar_lea.vmem %s19_s16, 2560  ;;  %p1579_p4 = scmp.lt.s32.totalorder %s19_s16, %s19_s16 }
   0x9   :  { %p1575_p3 = scmp.ne.s32.totalorder %s19_s16, %s1574_s24  ;;  %p1580_p5 = scmp.lt.s32.totalorder %s1574_s24, %s1574_s24 }
   0xb   :  { %p1581_p6 = por %p1580_p5, %p1579_p4 }
   0xd   :  { %p1582_p7 = pnand %p1581_p6, %p1575_p3 }
   0xf   :  { %1585 = shalt.err (!%p1582_p7)
}
  0x10   :  { %s1613_s25 = smov 256   ;;  %s1614_s26 = smov 16  }
  0x11   :  { %24 = dma.hbm_to_vmem [thread:$0]  %s1974_s1, 2560, %s19_s16, [#allocation4], %s1613_s25, %s1613_s25, %s1614_s26  }
  0x12   :  { %1608 = dma.done.wait [#allocation4], 2560  }
  0x13   :  { %1609 = vsyncadd [#allocation4], 4294964736  ;;  %v1615_v0 = vmov 0.0   ;;  %v33_v1 = vld [vmem:[#allocation3 + $0x8] sm:$0xff]  ;;  %v35_v2 = vld [vmem:[#allocation3 + $0x18] sm:$0xff]  ;;  %vm73_vm0 = vcmask 130048   ;;  %v63_v8 = vlaneseq }
  0x14   :  { %165 = vmatprep.mubr.f32.mxu1 %v1615_v0  ;;  %635 = vmatprep.mubr.f32.mxu0 %v1615_v0  ;;  %v32_v3 = vld [vmem:[#allocation3] sm:$0xff]  ;;  %v1313_v4 = vpack.c.bf16 %v35_v2, %v33_v1  ;;  %v34_v5 = vld [vmem:[#allocation3 + $0x10] sm:$0xff]  ;;  %v53_v7 = vld [vmem:[%s1973_s0] sm:$0xff]  ;;  %v1616_v20 = vmov 0.5   ;;  %s1617_s6 = smov 64   ;;  %vm283_vm3 = vcmask 523264  }
  0x15   :  { %v1315_v6 = vpack.c.bf16 %v34_v5, %v32_v3  ;;  %v64_v9 = vshrl.u32 %v63_v8, 7  ;;  %v239_v10 = vand.u32 127, %v63_v8  ;;  %v52_v12 = vld [vmem:[%s1976_s3] ss:$8 sm:$0x3]  ;;  %v39_v35 = vld [vmem:[#allocation3 + $0x38] sm:$0xff] }
  0x16   :  { %1314 = vmatprep.subr.bf16.mxu1 %v1313_v4  ;;  %v37_v34 = vld [vmem:[#allocation3 + $0x28] sm:$0xff]  ;;  %v36_v36 = vld [vmem:[#allocation3 + $0x20] sm:$0xff]  ;;  %v38_v38 = vld [vmem:[#allocation3 + $0x30] sm:$0xff]  ;;  %vm1045_vm4 = vcmask 261120   ;;  %s1619_s25 = smov 96   ;;  %vm1621_vm5 = vmmov 0  }
  0x17   :  { %1316 = vmatpush1.bf16.msra.mxu1 %v1315_v6  ;;  %v65_v11 = vsub.s32 0, %v64_v9  ;;  %v69_v13 = vsub.s32 1, %v64_v9  ;;  %v240_v14 = vadd.s32 128, %v239_v10  ;;  %vm270_vm2 = vcmp.lt.s32.totalorder %v239_v10, 32  ;;  %v54_v39 = vld [vmem:[%s1973_s0 + $0x8] sm:$0xff]  ;;  %v41_v41 = vld [vmem:[#allocation3 + $0x48] sm:$0xff] }
  0x18   :  { %v271_v33 = vsel %vm270_vm2, 1.0, %v1615_v0  ;;  %v1692_v37 = vpack.c.bf16 %v39_v35, %v37_v34  ;;  %v1697_v40 = vpack.c.bf16 %v38_v38, %v36_v36  ;;  %v43_v42 = vld [vmem:[#allocation3 + $0x58] sm:$0xff]  ;;  %v40_v43 = vld [vmem:[#allocation3 + $0x40] sm:$0xff]  ;;  %v42_v46 = vld [vmem:[#allocation3 + $0x50] sm:$0xff]  ;;  %s1622_s20 = smov [#allocation6]  }
  0x19   :  { %v1670_v15 = vrot.slane %v52_v12, %v65_v11  ;;  %v1672_v16 = vrot.slane %v52_v12, %v69_v13  ;;  %vm244_vm1 = vcmp.lt.s32.totalorder %v240_v14, 192  ;;  %v55_v44 = vld [vmem:[%s1973_s0 + $0x10] sm:$0xff]  ;;  %v1705_v45 = vpack.c.bf16 %v43_v42, %v41_v41  ;;  %v45_v48 = vld [vmem:[#allocation3 + $0x68] sm:$0xff]  ;;  %v44_v51 = vld [vmem:[#allocation3 + $0x60] sm:$0xff]  ;;  %s1251_s21 = sshll.u32 %s1622_s20, 4  ;;  %s1252_s21 = int_to_ptr.vmem [resolvable:$true] %s1251_s21 }
  0x1a   :  { %1260 = vmatmul.mubr.msk.f32.vlgmr.msra.gmra.mrb[0].mxu1 %vm73_vm0, %v53_v7  ;;  %v1675_v21 = vsel %vm244_vm1, 1.0, %v1616_v20  ;;  %v1679_v27 = vsel %vm244_vm1, 0.0, %v1616_v20  ;;  %1318 = vmatprep.subr.bf16.mxu1 %v1692_v37  ;;  %v1708_v47 = vpack.c.bf16 %v42_v46, %v40_v43  ;;  %v47_v49 = vld [vmem:[#allocation3 + $0x78] sm:$0xff]  ;;  %v46_v52 = vld [vmem:[#allocation3 + $0x70] sm:$0xff]  ;;  %v49_v53 = vld [vmem:[#allocation3 + $0x88] sm:$0xff]  ;;  %s1586_s22 = scalar_lea.vmem %s1252_s21, 128  ;;  %p1591_p9 = scmp.lt.s32.totalorder %s1252_s21, %s1252_s21 }
  0x1b   :  { %171 = vmatprep.mubr.f32.mxu1 %v1615_v0  ;;  %1320 = vmatpush1.bf16.msra.mxu1 %v1697_v40  ;;  %v1712_v50 = vpack.c.bf16 %v47_v49, %v45_v48  ;;  %v51_v54 = vld [vmem:[#allocation3 + $0x98] sm:$0xff]  ;;  %v56_v55 = vld [vmem:[%s1973_s0 + $0x18] sm:$0xff]  ;;  %v1722_v56 = vpack.c.bf16 %v46_v52, %v44_v51  ;;  %v50_v59 = vld [vmem:[#allocation3 + $0x90] sm:$0xff]  ;;  %p1587_p8 = scmp.ne.s32.totalorder %s1252_s21, %s1586_s22  ;;  %p1592_p10 = scmp.lt.s32.totalorder %s1586_s22, %s1586_s22 }
  0x1c   :  { %1366 = vmatprep.subr.bf16.mxu0 %v1692_v37  ;;  %1322 = vmatprep.subr.bf16.mxu1 %v1705_v45  ;;  %v1725_v57 = vpack.c.bf16 %v51_v54, %v49_v53  ;;  %v48_v58 = vld [vmem:[#allocation3 + $0x80] sm:$0xff]  ;;  %v57_v60 = vld [vmem:[%s1973_s0 + $0x20] sm:$0xff]  ;;  %v58_v62 = vld [vmem:[%s1973_s0 + $0x28] sm:$0xff] }
  0x1d   :  { %1368 = vmatpush1.bf16.msra.mxu0 %v1697_v40  ;;  %v1735_v61 = vpack.c.bf16 %v50_v59, %v48_v58  ;;  %v59_v63 = vld [vmem:[%s1973_s0 + $0x30] sm:$0xff]  ;;  %v60_v1 = vld [vmem:[%s1973_s0 + $0x38] sm:$0xff]  ;;  %v61_v2 = vld [vmem:[%s1973_s0 + $0x40] sm:$0xff]  ;;  %s1618_s0 = smov 32   ;;  %p1593_p11 = por %p1592_p10, %p1591_p9 }
  0x1e   :  { %1261 = vmatmul.mubr.msk.f32.gmra.mrb[2].mxu1 %vm73_vm0, %v54_v39  ;;  %1370 = vmatprep.subr.bf16.mxu0 %v1705_v45 }
  0x1f   :  { %177 = vmatprep.mubr.f32.mxu1 %v1615_v0  ;;  %1324 = vmatpush1.bf16.msra.mxu1 %v1708_v47  ;;  %p1594_p12 = pnand %p1593_p11, %p1587_p8 }
  0x20   :  { %1326 = vmatprep.subr.bf16.mxu1 %v1712_v50 }
  0x21   :  { %1372 = vmatpush1.bf16.msra.mxu0 %v1708_v47 }
  0x22   :  { %1262 = vmatmul.mubr.msk.f32.gmra.mrb[4].mxu1 %vm73_vm0, %v55_v44  ;;  %1374 = vmatprep.subr.bf16.mxu0 %v1712_v50 }
  0x23   :  { %183 = vmatprep.mubr.f32.mxu1 %v1615_v0  ;;  %1328 = vmatpush1.bf16.msra.mxu1 %v1722_v56 }
  0x24   :  { %1330 = vmatprep.subr.bf16.mxu1 %v1725_v57 }
  0x25   :  { %1376 = vmatpush1.bf16.msra.mxu0 %v1722_v56 }
  0x26   :  { %1263 = vmatmul.mubr.msk.f32.gmra.mrb[6].mxu1 %vm73_vm0, %v56_v55  ;;  %1378 = vmatprep.subr.bf16.mxu0 %v1725_v57 }
  0x27   :  { %189 = vmatprep.mubr.f32.mxu1 %v1615_v0  ;;  %1332 = vmatpush1.bf16.msra.mxu1 %v1735_v61 }
  0x28   :  { %1334 = vmatprep.subr.bf16.mxu1 %v1692_v37 }
  0x29   :  { %1380 = vmatpush1.bf16.msra.mxu0 %v1735_v61 }
  0x2a   :  { %1264 = vmatmul.mubr.msk.f32.gmra.mrb[8].mxu1 %vm73_vm0, %v57_v60  ;;  %1382 = vmatprep.subr.bf16.mxu0 %v1692_v37 }
  0x2b   :  { %195 = vmatprep.mubr.f32.mxu1 %v1615_v0 }
  0x2e   :  { %1265 = vmatmul.mubr.msk.f32.gmra.mrb[10].mxu1 %vm73_vm0, %v58_v62 }
  0x2f   :  { %201 = vmatprep.mubr.f32.mxu1 %v1615_v0 }
  0x32   :  { %1266 = vmatmul.mubr.msk.f32.gmra.mrb[12].mxu1 %vm73_vm0, %v59_v63 }
  0x33   :  { %207 = vmatprep.mubr.f32.mxu1 %v1615_v0 }
  0x36   :  { %1267 = vmatmul.mubr.msk.f32.gmra.mrb[14].mxu1 %vm73_vm0, %v60_v1 }
  0x37   :  { %213 = vmatprep.mubr.f32.mxu1 %v1615_v0 }
  0x3a   :  { %1268 = vmatmul.mubr.msk.f32.gmra.mrb[16].mxu1 %vm73_vm0, %v61_v2 }
  0x3b   :  { %350 = vmatprep.mubr.f32.mxu1 %v1615_v0 }
  0xed   :  { %v167_v17 = vpop.f32.mrb[0].mxu1 }
  0xee   :  { %v168_v18 = vadd.f32 %v167_v17, %v1670_v15  ;;  %v169_v19 = vpop.f32.mrb[1].mxu1 }
  0xef   :  { %v170_v22 = vadd.f32 %v169_v19, %v1672_v16 }
  0xf0   :  { %v253_v23 = vmul.f32 0.5, %v168_v18 }
  0xf1   :  { %v254_v24 = vmul.f32 %v1675_v21, %v170_v22 }
  0xf2   :  { %1500 = vtanh.f32 %v253_v23 }
  0xf3   :  { %1502 = vtanh.f32 %v254_v24 }
  0xfc   :  { %v1501_v25 = vpop.eup %1500 }
  0xfd   :  { %v1503_v26 = vpop.eup %1502  ;;  %v257_v28 = vmul.f32 0.5, %v1501_v25  ;;  %v1769_v10 = vpop.f32.mrb[8].mxu1 }
  0xfe   :  { %v258_v29 = vmul.f32 %v1503_v26, %v1675_v21  ;;  %v1771_v11 = vpop.f32.mrb[9].mxu1 }
  0xff   :  { %v1682_v30 = vadd.f32 0.5, %v257_v28 }
 0x100   :  { %v1685_v31 = vadd.f32 %v258_v29, %v1679_v27 }
 0x101   :  { %v261_v3 = vmul.f32 0.0, %v1682_v30  ;;  %v1773_v12 = vpop.f32.mrb[10].mxu1 }
 0x102   :  { %v262_v32 = vmul.f32 %v1685_v31, %v1682_v30  ;;  %v1775_v13 = vpop.f32.mrb[11].mxu1 }
 0x104   :  { %264 = vrot.lane.b32.xlu0 %v262_v32, %s1617_s6 }
 0x105   :  { %v1777_v14 = vpop.f32.mrb[12].mxu1 }
 0x106   :  { %v1779_v17 = vpop.f32.mrb[13].mxu1 }
 0x108   :  { %273 = vrot.lane.b32.xlu0 %v271_v33, %s1617_s6 }
 0x109   :  { %v1781_v18 = vpop.f32.mrb[14].mxu1 }
 0x10a   :  { %v1783_v19 = vpop.f32.mrb[15].mxu1 }
 0x10d   :  { %v1785_v20 = vpop.f32.mrb[16].mxu1 }
 0x10e   :  { %v1787_v23 = vpop.f32.mrb[17].mxu1 }
 0x176   :  { %v265_v4 = vpop.permute.xlu0 %264 }
 0x177   :  { %v267_v5 = vadd.f32 %v265_v4, %v261_v3 }
 0x179   :  { %1504 = vtanh.f32 %v267_v5 }
 0x17a   :  { %v274_v8 = vpop.permute.xlu0 %273 }
 0x17b   :  { %v277_v35 = vmul.f32 %v274_v8, %v267_v5 }
 0x183   :  { %v1505_v6 = vpop.eup %1504 }
 0x184   :  { %v269_v7 = vmul.f32 %v1505_v6, %v1685_v31 }
 0x186   :  { %v276_v9 = vmul.f32 %v274_v8, %v269_v7 }
 0x188   :  { %281 = vrot.lane.b32.xlu1 %v276_v9, %s1617_s6 }
 0x1fa   :  { %v282_v22 = vpop.permute.xlu1 %281 }
 0x1fb   :  { %1269 = vmatmul.mubr.msk.f32.vlgmr.msra.gmra.mrb[2].mxu1 %vm283_vm3, %v282_v22 }
 0x1fc   :  { %1336 = vmatpush1.bf16.msra.mxu1 %v1697_v40  ;;  %445 = vmatprep.mubr.f32.mxu1 %v1615_v0 }
 0x1fd   :  { %1338 = vmatprep.subr.bf16.mxu1 %v1705_v45 }
 0x200   :  { %1340 = vmatpush1.bf16.msra.mxu1 %v1708_v47 }
 0x201   :  { %1342 = vmatprep.subr.bf16.mxu1 %v1712_v50 }
 0x204   :  { %1344 = vmatpush1.bf16.msra.mxu1 %v1722_v56 }
 0x205   :  { %1346 = vmatprep.subr.bf16.mxu1 %v1725_v57 }
 0x208   :  { %1348 = vmatpush1.bf16.msra.mxu1 %v1735_v61 }
 0x209   :  { %1350 = vmatprep.subr.bf16.mxu1 %v1692_v37 }
 0x2ce   :  { %v352_v24 = vpop.f32.mrb[2].mxu1 }
 0x2cf   :  { %v1457_v25 = vadd.f32 %v352_v24, %v1670_v15  ;;  %v354_v26 = vpop.f32.mrb[3].mxu1 }
 0x2d0   :  { %v1458_v28 = vadd.f32 %v354_v26, %v1672_v16 }
 0x2d1   :  { %v357_v29 = vmul.f32 0.5, %v1457_v25 }
 0x2d2   :  { %v358_v30 = vmul.f32 %v1458_v28, %v1675_v21 }
 0x2d3   :  { %1506 = vtanh.f32 %v357_v29 }
 0x2d4   :  { %1508 = vtanh.f32 %v358_v30 }
 0x2dd   :  { %v1507_v31 = vpop.eup %1506 }
 0x2de   :  { %v1509_v32 = vpop.eup %1508  ;;  %v361_v33 = vmul.f32 0.5, %v1507_v31 }
 0x2df   :  { %v362_v34 = vmul.f32 %v1509_v32, %v1675_v21 }
 0x2e0   :  { %v363_v36 = vadd.f32 0.5, %v361_v33 }
 0x2e1   :  { %v364_v38 = vadd.f32 %v362_v34, %v1679_v27 }
 0x2e2   :  { %v365_v39 = vmul.f32 %v363_v36, %v277_v35 }
 0x2e3   :  { %v366_v41 = vmul.f32 %v364_v38, %v363_v36 }
 0x2e5   :  { %368 = vrot.lane.b32.xlu1 %v366_v41, %s1617_s6 }
 0x357   :  { %v369_v42 = vpop.permute.xlu1 %368 }
 0x358   :  { %v371_v43 = vadd.f32 %v369_v42, %v365_v39 }
 0x35a   :  { %1510 = vtanh.f32 %v371_v43 }
 0x364   :  { %v1511_v44 = vpop.eup %1510 }
 0x365   :  { %v373_v46 = vmul.f32 %v1511_v44, %v364_v38  ;;  %v192_v44 = vadd.f32 %v1769_v10, %v1670_v15 }
 0x367   :  { %377 = vrot.lane.b32.xlu0 %v373_v46, %s1617_s6  ;;  %v194_v46 = vadd.f32 %v1771_v11, %v1672_v16 }
 0x3d9   :  { %v378_v48 = vpop.permute.xlu0 %377 }
 0x3da   :  { %1270 = vmatmul.mubr.msk.f32.vlgmr.msra.gmra.mrb[4].mxu1 %vm283_vm3, %v378_v48 }
 0x3db   :  { %1352 = vmatpush1.bf16.msra.mxu1 %v1697_v40  ;;  %540 = vmatprep.mubr.f32.mxu1 %v1615_v0 }
 0x3dc   :  { %1354 = vmatprep.subr.bf16.mxu1 %v1705_v45 }
 0x3df   :  { %1356 = vmatpush1.bf16.msra.mxu1 %v1708_v47 }
 0x3e0   :  { %1358 = vmatprep.subr.bf16.mxu1 %v1712_v50 }
 0x3e3   :  { %1360 = vmatpush1.bf16.msra.mxu1 %v1722_v56 }
 0x3e4   :  { %1362 = vmatprep.subr.bf16.mxu1 %v1725_v57 }
 0x3e7   :  { %1364 = vmatpush1.bf16.msra.mxu1 %v1735_v61 }
 0x4ad   :  { %v447_v49 = vpop.f32.mrb[4].mxu1 }
 0x4ae   :  { %v1459_v51 = vadd.f32 %v447_v49, %v1670_v15  ;;  %v449_v52 = vpop.f32.mrb[5].mxu1 }
 0x4af   :  { %v1460_v53 = vadd.f32 %v449_v52, %v1672_v16 }
 0x4b0   :  { %v452_v54 = vmul.f32 0.5, %v1459_v51 }
 0x4b1   :  { %v453_v55 = vmul.f32 %v1460_v53, %v1675_v21 }
 0x4b2   :  { %1512 = vtanh.f32 %v452_v54 }
 0x4b3   :  { %1514 = vtanh.f32 %v453_v55 }
 0x4bc   :  { %v1513_v58 = vpop.eup %1512 }
 0x4bd   :  { %v1515_v59 = vpop.eup %1514  ;;  %v456_v60 = vmul.f32 0.5, %v1513_v58 }
 0x4be   :  { %v457_v62 = vmul.f32 %v1515_v59, %v1675_v21 }
 0x4bf   :  { %v458_v63 = vadd.f32 0.5, %v456_v60 }
 0x4c0   :  { %v459_v1 = vadd.f32 %v457_v62, %v1679_v27 }
 0x4c1   :  { %v460_v3 = vmul.f32 %v458_v63, %v371_v43 }
 0x4c2   :  { %v461_v2 = vmul.f32 %v459_v1, %v458_v63 }
 0x4c4   :  { %463 = vrot.lane.b32.xlu1 %v461_v2, %s1617_s6 }
 0x536   :  { %v464_v4 = vpop.permute.xlu1 %463 }
 0x537   :  { %v466_v5 = vadd.f32 %v464_v4, %v460_v3 }
 0x539   :  { %1516 = vtanh.f32 %v466_v5 }
 0x543   :  { %v1517_v6 = vpop.eup %1516 }
 0x544   :  { %v468_v7 = vmul.f32 %v1517_v6, %v459_v1  ;;  %v198_v6 = vadd.f32 %v1773_v12, %v1670_v15 }
 0x546   :  { %472 = vrot.lane.b32.xlu0 %v468_v7, %s1617_s6  ;;  %v200_v7 = vadd.f32 %v1775_v13, %v1672_v16 }
 0x5b8   :  { %v473_v8 = vpop.permute.xlu0 %472 }
 0x5b9   :  { %1271 = vmatmul.mubr.msk.f32.vlgmr.msra.gmra.mrb[6].mxu1 %vm283_vm3, %v473_v8 }
 0x5ba   :  { %1299 = vmatprep.mubr.msk.f32.mxu1 %vm1621_vm5, %v1615_v0 }
 0x68c   :  { %v542_v9 = vpop.f32.mrb[6].mxu1 }
 0x68d   :  { %v1461_v22 = vadd.f32 %v542_v9, %v1670_v15  ;;  %v544_v24 = vpop.f32.mrb[7].mxu1 }
 0x68e   :  { %v1462_v25 = vadd.f32 %v544_v24, %v1672_v16 }
 0x68f   :  { %v547_v26 = vmul.f32 0.5, %v1461_v22 }
 0x690   :  { %v548_v28 = vmul.f32 %v1462_v25, %v1675_v21 }
 0x691   :  { %1518 = vtanh.f32 %v547_v26 }
 0x692   :  { %1520 = vtanh.f32 %v548_v28 }
 0x69b   :  { %v1519_v29 = vpop.eup %1518 }
 0x69c   :  { %v1521_v30 = vpop.eup %1520  ;;  %v551_v31 = vmul.f32 0.5, %v1519_v29 }
 0x69d   :  { %v552_v32 = vmul.f32 %v1521_v30, %v1675_v21 }
 0x69e   :  { %v553_v33 = vadd.f32 0.5, %v551_v31 }
 0x69f   :  { %v554_v34 = vadd.f32 %v552_v32, %v1679_v27 }
 0x6a0   :  { %v555_v36 = vmul.f32 %v553_v33, %v466_v5 }
 0x6a1   :  { %v556_v35 = vmul.f32 %v554_v34, %v553_v33 }
 0x6a3   :  { %558 = vrot.lane.b32.xlu1 %v556_v35, %s1617_s6 }
 0x715   :  { %v559_v38 = vpop.permute.xlu1 %558 }
 0x716   :  { %v561_v39 = vadd.f32 %v559_v38, %v555_v36 }
 0x718   :  { %1522 = vtanh.f32 %v561_v39 }
 0x722   :  { %v1523_v41 = vpop.eup %1522 }
 0x723   :  { %v563_v42 = vmul.f32 %v1523_v41, %v554_v34  ;;  %v204_v41 = vadd.f32 %v1777_v14, %v1670_v15 }
 0x725   :  { %567 = vrot.lane.b32.xlu0 %v563_v42, %s1617_s6  ;;  %v206_v42 = vadd.f32 %v1779_v17, %v1672_v16 }
 0x797   :  { %v568_v43 = vpop.permute.xlu0 %567 }
 0x798   :  { %1272 = vmatmul.mubr.msk.f32.vlgmr.msra.gmra.mrb[0].mxu0 %vm283_vm3, %v568_v43 }
 0x799   :  { %1384 = vmatpush1.bf16.msra.mxu0 %v1697_v40  ;;  %730 = vmatprep.mubr.f32.mxu0 %v1615_v0 }
 0x79a   :  { %1386 = vmatprep.subr.bf16.mxu0 %v1705_v45 }
 0x79d   :  { %1388 = vmatpush1.bf16.msra.mxu0 %v1708_v47 }
 0x79e   :  { %1390 = vmatprep.subr.bf16.mxu0 %v1712_v50 }
 0x7a1   :  { %1392 = vmatpush1.bf16.msra.mxu0 %v1722_v56 }
 0x7a2   :  { %1394 = vmatprep.subr.bf16.mxu0 %v1725_v57 }
 0x7a5   :  { %1396 = vmatpush1.bf16.msra.mxu0 %v1735_v61 }
 0x7a6   :  { %1398 = vmatprep.subr.bf16.mxu0 %v1692_v37 }
 0x86b   :  { %v637_v48 = vpop.f32.mrb[0].mxu0 }
 0x86c   :  { %v638_v49 = vadd.f32 %v637_v48, %v192_v44  ;;  %v639_v51 = vpop.f32.mrb[1].mxu0 }
 0x86d   :  { %v640_v52 = vadd.f32 %v639_v51, %v194_v46 }
 0x86e   :  { %v642_v53 = vmul.f32 0.5, %v638_v49 }
 0x86f   :  { %v643_v54 = vmul.f32 %v640_v52, %v1675_v21 }
 0x870   :  { %1524 = vtanh.f32 %v642_v53 }
 0x871   :  { %1526 = vtanh.f32 %v643_v54 }
 0x87a   :  { %v1525_v55 = vpop.eup %1524 }
 0x87b   :  { %v1527_v58 = vpop.eup %1526  ;;  %v646_v59 = vmul.f32 0.5, %v1525_v55 }
 0x87c   :  { %v647_v60 = vmul.f32 %v1527_v58, %v1675_v21 }
 0x87d   :  { %v648_v62 = vadd.f32 0.5, %v646_v59 }
 0x87e   :  { %v649_v10 = vadd.f32 %v647_v60, %v1679_v27 }
 0x87f   :  { %v650_v11 = vmul.f32 %v648_v62, %v561_v39 }
 0x880   :  { %v651_v63 = vmul.f32 %v649_v10, %v648_v62 }
 0x882   :  { %653 = vrot.lane.b32.xlu1 %v651_v63, %s1617_s6 }
 0x8f4   :  { %v654_v1 = vpop.permute.xlu1 %653 }
 0x8f5   :  { %v656_v2 = vadd.f32 %v654_v1, %v650_v11  ;;  %v210_v11 = vadd.f32 %v1781_v18, %v1670_v15 }
 0x8f7   :  { %1528 = vtanh.f32 %v656_v2 }
 0x901   :  { %v1529_v3 = vpop.eup %1528 }
 0x902   :  { %v658_v4 = vmul.f32 %v1529_v3, %v649_v10 }
 0x904   :  { %662 = vrot.lane.b32.xlu0 %v658_v4, %s1617_s6 }
 0x976   :  { %v663_v5 = vpop.permute.xlu0 %662 }
 0x977   :  { %1273 = vmatmul.mubr.msk.f32.vlgmr.msra.gmra.mrb[2].mxu0 %vm283_vm3, %v663_v5 }
 0x978   :  { %1400 = vmatpush1.bf16.msra.mxu0 %v1697_v40  ;;  %825 = vmatprep.mubr.f32.mxu0 %v1615_v0 }
 0x979   :  { %1402 = vmatprep.subr.bf16.mxu0 %v1705_v45 }
 0x97c   :  { %1404 = vmatpush1.bf16.msra.mxu0 %v1708_v47 }
 0x97d   :  { %1406 = vmatprep.subr.bf16.mxu0 %v1712_v50 }
 0x980   :  { %1408 = vmatpush1.bf16.msra.mxu0 %v1722_v56 }
 0x981   :  { %1410 = vmatprep.subr.bf16.mxu0 %v1725_v57 }
 0x984   :  { %1412 = vmatpush1.bf16.msra.mxu0 %v1735_v61 }
 0x985   :  { %1414 = vmatprep.subr.bf16.mxu0 %v1692_v37 }
 0xa4a   :  { %v732_v8 = vpop.f32.mrb[2].mxu0 }
 0xa4b   :  { %v733_v9 = vadd.f32 %v732_v8, %v198_v6  ;;  %v734_v22 = vpop.f32.mrb[3].mxu0 }
 0xa4c   :  { %v735_v24 = vadd.f32 %v734_v22, %v200_v7 }
 0xa4d   :  { %v737_v25 = vmul.f32 0.5, %v733_v9 }
 0xa4e   :  { %v738_v26 = vmul.f32 %v735_v24, %v1675_v21 }
 0xa4f   :  { %1530 = vtanh.f32 %v737_v25  ;;  %v216_v25 = vadd.f32 %v1785_v20, %v1670_v15 }
 0xa50   :  { %1532 = vtanh.f32 %v738_v26  ;;  %v218_v26 = vadd.f32 %v1787_v23, %v1672_v16 }
 0xa59   :  { %v1531_v28 = vpop.eup %1530 }
 0xa5a   :  { %v1533_v29 = vpop.eup %1532  ;;  %v741_v30 = vmul.f32 0.5, %v1531_v28 }
 0xa5b   :  { %v742_v31 = vmul.f32 %v1533_v29, %v1675_v21 }
 0xa5c   :  { %v743_v32 = vadd.f32 0.5, %v741_v30 }
 0xa5d   :  { %v744_v12 = vadd.f32 %v742_v31, %v1679_v27 }
 0xa5e   :  { %v745_v13 = vmul.f32 %v743_v32, %v656_v2 }
 0xa5f   :  { %v746_v33 = vmul.f32 %v744_v12, %v743_v32 }
 0xa61   :  { %748 = vrot.lane.b32.xlu1 %v746_v33, %s1617_s6 }
 0xad3   :  { %v749_v34 = vpop.permute.xlu1 %748 }
 0xad4   :  { %v751_v35 = vadd.f32 %v749_v34, %v745_v13 }
 0xad6   :  { %1534 = vtanh.f32 %v751_v35 }
 0xae0   :  { %v1535_v36 = vpop.eup %1534 }
 0xae1   :  { %v753_v38 = vmul.f32 %v1535_v36, %v744_v12 }
 0xae3   :  { %757 = vrot.lane.b32.xlu0 %v753_v38, %s1617_s6 }
 0xb55   :  { %v758_v39 = vpop.permute.xlu0 %757 }
 0xb56   :  { %1274 = vmatmul.mubr.msk.f32.vlgmr.msra.gmra.mrb[4].mxu0 %vm283_vm3, %v758_v39 }
 0xb57   :  { %1416 = vmatpush1.bf16.msra.mxu0 %v1697_v40  ;;  %920 = vmatprep.mubr.f32.mxu0 %v1615_v0 }
 0xb58   :  { %1418 = vmatprep.subr.bf16.mxu0 %v1705_v45 }
 0xb5b   :  { %1420 = vmatpush1.bf16.msra.mxu0 %v1708_v47 }
 0xb5c   :  { %1422 = vmatprep.subr.bf16.mxu0 %v1712_v50 }
 0xb5f   :  { %1424 = vmatpush1.bf16.msra.mxu0 %v1722_v56 }
 0xb60   :  { %1426 = vmatprep.subr.bf16.mxu0 %v1725_v57 }
 0xb63   :  { %1428 = vmatpush1.bf16.msra.mxu0 %v1735_v61 }
 0xb64   :  { %1430 = vmatprep.subr.bf16.mxu0 %v1692_v37 }
 0xc29   :  { %v827_v43 = vpop.f32.mrb[4].mxu0 }
 0xc2a   :  { %v828_v44 = vadd.f32 %v827_v43, %v204_v41  ;;  %v829_v46 = vpop.f32.mrb[5].mxu0 }
 0xc2b   :  { %v830_v48 = vadd.f32 %v829_v46, %v206_v42 }
 0xc2c   :  { %v832_v49 = vmul.f32 0.5, %v828_v44 }
 0xc2d   :  { %v833_v51 = vmul.f32 %v830_v48, %v1675_v21 }
 0xc2e   :  { %1536 = vtanh.f32 %v832_v49 }
 0xc2f   :  { %1538 = vtanh.f32 %v833_v51 }
 0xc38   :  { %v1537_v52 = vpop.eup %1536 }
 0xc39   :  { %v1539_v53 = vpop.eup %1538  ;;  %v836_v54 = vmul.f32 0.5, %v1537_v52  ;;  %v1040_v52 = vld [vmem:[%s1976_s3 + $0x2] ss:$0 sm:$0xff] }
 0xc3a   :  { %v837_v37 = vmul.f32 %v1539_v53, %v1675_v21  ;;  %v1074_v53 = vld [vmem:[%s1975_s2] sm:$0xff] }
 0xc3b   :  { %v838_v55 = vadd.f32 0.5, %v836_v54  ;;  %v1075_v54 = vld [vmem:[%s1975_s2 + $0x10] sm:$0xff] }
 0xc3c   :  { %v839_v14 = vadd.f32 %v837_v37, %v1679_v27  ;;  %v1076_v37 = vld [vmem:[%s1975_s2 + $0x20] sm:$0xff] }
 0xc3d   :  { %v840_v17 = vmul.f32 %v838_v55, %v751_v35 }
 0xc3e   :  { %v841_v58 = vmul.f32 %v839_v14, %v838_v55  ;;  %v1620_v55 = vmov 0.0|0.0  }
 0xc3f   :  { %1445 = vmatprep.subr.bf16.mxu1 %v1620_v55 }
 0xc40   :  { %843 = vrot.lane.b32.xlu1 %v841_v58, %s1617_s6  ;;  %v1077_v58 = vld [vmem:[%s1975_s2 + $0x30] sm:$0xff] }
 0xcb2   :  { %v844_v59 = vpop.permute.xlu1 %843 }
 0xcb3   :  { %v846_v60 = vadd.f32 %v844_v59, %v840_v17  ;;  %v1449_v17 = vpack.c.bf16 %v1077_v58, %v1076_v37 }
 0xcb5   :  { %1540 = vtanh.f32 %v846_v60 }
 0xcbf   :  { %v1541_v62 = vpop.eup %1540 }
 0xcc0   :  { %v848_v10 = vmul.f32 %v1541_v62, %v839_v14  ;;  %v1446_v14 = vpack.c.bf16 %v1075_v54, %v1074_v53 }
 0xcc2   :  { %852 = vrot.lane.b32.xlu0 %v848_v10, %s1617_s6  ;;  %1447 = vmatpush3.bf16.msra.mxu1 %v1446_v14 }
 0xcc3   :  { %1448 = vmatprep.subr.bf16.mxu1 %v1620_v55 }
 0xcc6   :  { %1450 = vmatpush3.bf16.msra.mxu1 %v1449_v17 }
 0xcc7   :  { %1451 = vmatprep.subr.bf16.mxu1 %v1620_v55 }
 0xd34   :  { %v853_v63 = vpop.permute.xlu0 %852 }
 0xd35   :  { %1275 = vmatmul.mubr.msk.f32.vlgmr.msra.gmra.mrb[6].mxu0 %vm283_vm3, %v853_v63 }
 0xd36   :  { %1432 = vmatpush1.bf16.msra.mxu0 %v1697_v40  ;;  %1015 = vmatprep.mubr.f32.mxu0 %v1615_v0  ;;  %v212_v40 = vadd.f32 %v1783_v19, %v1672_v16 }
 0xd37   :  { %1434 = vmatprep.subr.bf16.mxu0 %v1705_v45 }
 0xd3a   :  { %1436 = vmatpush1.bf16.msra.mxu0 %v1708_v47 }
 0xd3b   :  { %1438 = vmatprep.subr.bf16.mxu0 %v1712_v50 }
 0xd3e   :  { %1440 = vmatpush1.bf16.msra.mxu0 %v1722_v56 }
 0xd3f   :  { %1442 = vmatprep.subr.bf16.mxu0 %v1725_v57 }
 0xd42   :  { %1444 = vmatpush1.bf16.msra.mxu0 %v1735_v61 }
 0xe08   :  { %v922_v1 = vpop.f32.mrb[6].mxu0 }
 0xe09   :  { %v923_v2 = vadd.f32 %v922_v1, %v210_v11  ;;  %v924_v3 = vpop.f32.mrb[7].mxu0 }
 0xe0a   :  { %v925_v45 = vadd.f32 %v924_v3, %v212_v40 }
 0xe0b   :  { %v927_v4 = vmul.f32 0.5, %v923_v2 }
 0xe0c   :  { %v928_v47 = vmul.f32 %v925_v45, %v1675_v21 }
 0xe0d   :  { %1542 = vtanh.f32 %v927_v4 }
 0xe0e   :  { %1544 = vtanh.f32 %v928_v47 }
 0xe17   :  { %v1543_v50 = vpop.eup %1542 }
 0xe18   :  { %v1545_v56 = vpop.eup %1544  ;;  %v931_v57 = vmul.f32 0.5, %v1543_v50 }
 0xe19   :  { %v932_v61 = vmul.f32 %v1545_v56, %v1675_v21  ;;  %v1079_v56 = vld [vmem:[%s1975_s2 + $0x8] sm:$0xff] }
 0xe1a   :  { %v933_v5 = vadd.f32 0.5, %v931_v57  ;;  %v1080_v57 = vld [vmem:[%s1975_s2 + $0x18] sm:$0xff] }
 0xe1b   :  { %v934_v18 = vadd.f32 %v932_v61, %v1679_v27  ;;  %v1081_v61 = vld [vmem:[%s1975_s2 + $0x28] sm:$0xff] }
 0xe1c   :  { %v935_v19 = vmul.f32 %v933_v5, %v846_v60 }
 0xe1d   :  { %v936_v6 = vmul.f32 %v934_v18, %v933_v5  ;;  %v1452_v5 = vpack.c.bf16 %v1080_v57, %v1079_v56 }
 0xe1f   :  { %938 = vrot.lane.b32.xlu1 %v936_v6, %s1617_s6 }
 0xe91   :  { %v939_v7 = vpop.permute.xlu1 %938 }
 0xe92   :  { %v941_v8 = vadd.f32 %v939_v7, %v935_v19 }
 0xe94   :  { %1546 = vtanh.f32 %v941_v8 }
 0xe9e   :  { %v1547_v9 = vpop.eup %1546 }
 0xe9f   :  { %v943_v22 = vmul.f32 %v1547_v9, %v934_v18  ;;  %v1082_v18 = vld [vmem:[%s1975_s2 + $0x38] sm:$0xff] }
 0xea0   :  { %v1455_v6 = vpack.c.bf16 %v1082_v18, %v1081_v61 }
 0xea1   :  { %947 = vrot.lane.b32.xlu0 %v943_v22, %s1617_s6 }
 0xf13   :  { %v948_v24 = vpop.permute.xlu0 %947 }
 0xf14   :  { %1276 = vmatmul.mubr.msk.f32.vlgmr.msra.gmra.mrb[8].mxu0 %vm283_vm3, %v948_v24 }
 0xfe7   :  { %v1017_v28 = vpop.f32.mrb[8].mxu0 }
 0xfe8   :  { %v1018_v29 = vadd.f32 %v1017_v28, %v216_v25  ;;  %v1019_v30 = vpop.f32.mrb[9].mxu0 }
 0xfe9   :  { %v1020_v31 = vadd.f32 %v1019_v30, %v218_v26  ;;  %v1083_v26 = vld [vmem:[%s1976_s3 + $0x4] ss:$0 sm:$0xff] }
 0xfea   :  { %v1022_v32 = vmul.f32 0.5, %v1018_v29 }
 0xfeb   :  { %v1023_v12 = vmul.f32 %v1020_v31, %v1675_v21 }
 0xfec   :  { %1548 = vtanh.f32 %v1022_v32 }
 0xfed   :  { %1550 = vtanh.f32 %v1023_v12 }
 0xff6   :  { %v1549_v33 = vpop.eup %1548 }
 0xff7   :  { %v1551_v13 = vpop.eup %1550  ;;  %v1026_v34 = vmul.f32 0.5, %v1549_v33 }
 0xff8   :  { %v1027_v35 = vmul.f32 %v1551_v13, %v1675_v21  ;;  %v1039_v21 = vld [vmem:[%s1976_s3 + $0x1] ss:$0 sm:$0xff] }
 0xff9   :  { %v1028_v36 = vadd.f32 0.5, %v1026_v34 }
 0xffa   :  { %v1029_v15 = vadd.f32 %v1027_v35, %v1679_v27 }
 0xffb   :  { %v1030_v16 = vmul.f32 %v1028_v36, %v941_v8 }
 0xffc   :  { %v1031_v20 = vmul.f32 %v1029_v15, %v1028_v36 }
 0xffe   :  { %1033 = vrot.lane.b32.xlu1 %v1031_v20, %s1617_s6 }
0x1070   :  { %v1034_v23 = vpop.permute.xlu1 %1033 }
0x1071   :  { %v1036_v38 = vadd.f32 %v1034_v23, %v1030_v16 }
0x1073   :  { %1552 = vtanh.f32 %v1036_v38 }
0x107d   :  { %v1553_v39 = vpop.eup %1552 }
0x107e   :  { %v1038_v41 = vmul.f32 %v1553_v39, %v1029_v15 }
0x1080   :  { %1042 = vrot.lane.b32.xlu0 %v1038_v41, %s1618_s0 }
0x10f2   :  { %v1043_v42 = vpop.permute.xlu0 %1042 }
0x10f3   :  { %v1046_v43 = vsel %vm1045_vm4, %v1043_v42, 0.0 }
0x10f4   :  { %1047 = vadd.xlane.f32.xlu1 %v1046_v43 }
0x1105   :  { %1065 = vrot.lane.b32.xlu1 %v1039_v21, %s1619_s25 }
0x1181   :  { %v1048_v27 = vpop.xlane.xlu1 %1047 }
0x1182   :  { %v1050_v44 = vmul.f32 0.03125, %v1048_v27 }
0x1184   :  { %v1051_v46 = vsub.f32 %v1038_v41, %v1050_v44 }
0x1185   :  { %v1066_v63 = vpop.permute.xlu1 %1065 }
0x1186   :  { %v1052_v48 = vmul.f32 %v1051_v46, %v1051_v46 }
0x1188   :  { %1054 = vrot.lane.b32.xlu0 %v1052_v48, %s1618_s0 }
0x11fa   :  { %v1055_v49 = vpop.permute.xlu0 %1054 }
0x11fb   :  { %v1057_v51 = vsel %vm1045_vm4, %v1055_v49, 0.0 }
0x11fc   :  { %1058 = vadd.xlane.f32.xlu0 %v1057_v51 }
0x1212   :  { %1070 = vrot.lane.b32.xlu0 %v1040_v52, %s1619_s25 }
0x1289   :  { %v1059_v59 = vpop.xlane.xlu0 %1058 }
0x128a   :  { %v1060_v60 = vmul.f32 0.03125, %v1059_v59 }
0x128c   :  { %v1061_v62 = vadd.f32 1e-05, %v1060_v60 }
0x128d   :  { %v1071_v40 = vpop.permute.xlu0 %1070 }
0x128e   :  { %1554 = vrsqrt.f32 %v1061_v62 }
0x1298   :  { %v1555_v10 = vpop.eup %1554 }
0x1299   :  { %v1063_v11 = vmul.f32 %v1555_v10, %v1051_v46 }
0x129b   :  { %v1068_v1 = vmul.f32 %v1066_v63, %v1063_v11 }
0x129d   :  { %v1073_v2 = vadd.f32 %v1071_v40, %v1068_v1 }
0x129f   :  { %v1277_v3 = vmul.f32 -1.442695, %v1073_v2 }
0x12a1   :  { %1556 = vpow2.f32 %v1277_v3 }
0x12ab   :  { %v1557_v45 = vpop.eup %1556 }
0x12ac   :  { %v1087_v4 = vadd.f32 1.0, %v1557_v45 }
0x12ae   :  { %1558 = vrcp.f32 %v1087_v4 }
0x12b8   :  { %v1559_v47 = vpop.eup %1558 }
0x12b9   :  { %1091 = vrot.lane.b32.xlu1 %v1559_v47, %s1618_s0 }
0x132b   :  { %v1092_v50 = vpop.permute.xlu1 %1091 }
0x132c   :  { %1300 = vmatmul.mubr.msk.f32.vlgmr.msra.gmra.mrb[18].mxu1 %vm1045_vm4, %v1092_v50 }
0x132d   :  { %1310 = vmatprep.mubr.msk.f32.mxu1 %vm1621_vm5, %v1615_v0  ;;  %1453 = vmatpush3.bf16.msra.mxu1 %v1452_v5  ;;  %v1078_v0 = vld [vmem:[%s1976_s3 + $0x3] ss:$0 sm:$0xff] }
0x132e   :  { %1454 = vmatprep.subr.bf16.mxu1 %v1620_v55 }
0x1331   :  { %1456 = vmatpush3.bf16.msra.mxu1 %v1455_v6 }
0x13ff   :  { %v1161_v19 = vpop.f32.mrb[18].mxu1 }
0x1400   :  { %v1162_v7 = vadd.f32 %v1161_v19, %v1078_v0  ;;  %v1301_v8 = vpop.f32.mrb[19].mxu1 }
0x1402   :  { %v1279_v9 = vmul.f32 -1.442695, %v1162_v7 }
0x1404   :  { %1560 = vpow2.f32 %v1279_v9 }
0x140e   :  { %v1561_v22 = vpop.eup %1560 }
0x140f   :  { %v1168_v24 = vadd.f32 1.0, %v1561_v22 }
0x1411   :  { %1562 = vrcp.f32 %v1168_v24 }
0x141b   :  { %v1563_v25 = vpop.eup %1562 }
0x141c   :  { %1311 = vmatmul.mubr.msk.f32.vlgmr.msra.gmra.mrb[20].mxu1 %vm1045_vm4, %v1563_v25 }
0x14ef   :  { %v1240_v28 = vpop.f32.mrb[20].mxu1 }
0x14f0   :  { %v1241_v29 = vadd.f32 %v1240_v28, %v1083_v26  ;;  %v1312_v30 = vpop.f32.mrb[21].mxu1 }
0x14f2   :  { %1244 = vst [vmem:[#allocation6] sm:$0xff] %v1241_v29 }
0x14f3   :  { %1597 = shalt.err (!%p1594_p12)
}
0x14f4   :  { %s1598_s24 = scalar_lea.hbm %s1977_s4, 128 }
0x14f5   :  { %p1599_p13 = scmp.ne.s32.totalorder %s1977_s4, %s1598_s24  ;;  %p1602_p0 = scmp.lt.u32.totalorder %s1598_s24, %s1977_s4 }
0x14f7   :  { %p1604_p1 = pnand %p1602_p0, %p1599_p13 }
0x14f9   :  { %1607 = shalt.err (!%p1604_p1)
}
0x14fa   :  { %1254 = dma.vmem_to_hbm [thread:$0]  %s1252_s21, 128, %s1977_s4, [#allocation5]  }
0x14fb   :  { %1610 = dma.done.wait [#allocation5], 128  }
0x14fc   :  { %1611 = vsyncadd [#allocation5], 4294967168 }
0x14fd   :  { %1258 = vsyncpa [#allocation4], 1 }
0x14fe   :  { %1259 = vsyncpa [#allocation5], 1 }

</bundles_post_ra>
